<compile_context>
chip_gen: v7x
topology: tpu7x:2x2x1
jax: 0.10.0
libtpu: 0.0.40
codegen_flags: <defaults>
</compile_context>

<pallas_src>
import functools

import jax
import jax.numpy as jnp
from jax.experimental import pallas as pl
from jax.experimental.pallas import tpu as pltpu

_LANE = 128
_EPS = 1e-5


# --------------------------------------------------------------------------- #
# Tiling / VMEM helpers
# --------------------------------------------------------------------------- #
def _round_up(v, m):
    return ((v + m - 1) // m) * m


def _vmem_capacity_bytes():
    try:
        return int(pltpu.get_tpu_info().vmem_capacity_bytes)
    except Exception:  # pragma: no cover - conservative fallback (v7x per-TC)
        return 64 * 1024 * 1024


def _vmem_budget_bytes():
    # ~70% of physical: ~44 MiB on v7x, ~90 MiB on v5e/v6e.
    return _vmem_capacity_bytes() * 7 // 10


def _vmem_usage(block_b, block_c, D, grid_c, x_it, w_it, out_it):
    """Estimated VMEM footprint of one pallas_call configuration."""
    w_bufs = 1 if grid_c == 1 else 2          # Buffered(1) when weight is resident
    return (2 * block_b * D * x_it            # x tile, double-buffered
            + 2 * D * 4                       # gamma + beta, single-buffered
            + w_bufs * D * block_c * w_it     # weight tile(s)
            + w_bufs * block_c * 4            # bias tile(s)
            + 2 * block_b * block_c * out_it  # out tile, double-buffered
            + block_b * D * w_it              # x_norm VMEM scratch
            + 3 * block_b * D * 4             # f32 LN intermediates in the body
            + 2 * block_b * block_c * 4)      # f32 matmul acc + bias-add temp


def _pick_block_c(D, C, w_it, budget):
    """Class-tile size and padded class count (chosen once at prep time)."""
    Cp = _round_up(C, _LANE)
    w_budget = budget // 2                    # leave room for x / out / scratch
    if D * Cp * w_it <= w_budget:
        return Cp, Cp                         # whole weight resident, one C tile
    for tc in (4096, 2048, 1024, 512, 256, 128):
        if tc < Cp and 2 * D * tc * w_it <= w_budget:
            return tc, _round_up(Cp, tc)
    return 128, _round_up(Cp, 128)


def _pick_block_b(B, D, block_c, grid_c, x_it, w_it, out_it, budget):
    """Largest MXU-friendly batch tile whose estimated footprint fits VMEM."""
    Bp8 = max(8, _round_up(B, 8))
    cands = sorted({t for t in (8, 16, 32, 64, 128, 256, 512, 1024, 2048)
                    if t <= Bp8} | {min(Bp8, 2048)}, reverse=True)
    block_b = 8
    for tb in cands:
        if _vmem_usage(tb, block_c, D, grid_c, x_it, w_it, out_it) <= budget:
            block_b = tb
            break
    # v7x megacore: keep >= 2 batch tiles when the class dim is not tiled so
    # the "parallel" axis has work for both TensorCores.
    if grid_c == 1 and Bp8 >= 16 and block_b >= Bp8:
        block_b = min(block_b, _round_up(pl.cdiv(Bp8, 2), 8))
    return block_b


# --------------------------------------------------------------------------- #
# Kernel
# --------------------------------------------------------------------------- #
def mlp_head_kernel(x_ref, gamma_ref, beta_ref, w_ref, b_ref, o_ref, xnorm_ref):
    # x: (TB, D)  gamma/beta: (1, D)  w: (D, TC)  b: (1, TC)  o: (TB, TC)
    # xnorm scratch: (TB, D) in the matmul compute dtype; persists across the
    # class-tile axis (j), recomputed at j == 0 for every batch tile.
    @pl.when(pl.program_id(1) == 0)
    def _():
        x = x_ref[...].astype(jnp.float32)
        d_inv = 1.0 / x.shape[-1]
        # Independent reductions s1/s2 -> shorter dep chain, no full-tile
        # 'centered' temporary.  Biased variance, eps matches torch (1e-5).
        s1 = jnp.sum(x, axis=-1, keepdims=True)
        s2 = jnp.sum(x * x, axis=-1, keepdims=True)
        mean = s1 * d_inv
        var = s2 * d_inv - mean * mean
        inv = jax.lax.rsqrt(var + _EPS)
        xn = (x - mean) * inv
        xn = (xn * gamma_ref[...].astype(jnp.float32)
              + beta_ref[...].astype(jnp.float32))
        xnorm_ref[...] = xn.astype(xnorm_ref.dtype)

    acc = jnp.dot(xnorm_ref[...], w_ref[...],
                  preferred_element_type=jnp.float32)
    o_ref[...] = (acc + b_ref[...].astype(jnp.float32)).astype(o_ref.dtype)


# --------------------------------------------------------------------------- #
# Parameter prep (one-time, outside the per-call path)
# --------------------------------------------------------------------------- #
def prepare_mlp_head_params(gamma, beta, weight, bias, *, block_c=None,
                            weight_compute_dtype=None):
    """Pads / reshapes the parameters once so the forward path never re-pads
    the weight (a full HBM copy) on every call.

    weight_compute_dtype=jnp.bfloat16 halves the resident weight and boosts
    MXU throughput; left None here to match the f32 PyTorch module exactly.
    """
    D, C = weight.shape
    if weight_compute_dtype is not None:
        weight = weight.astype(weight_compute_dtype)
    if block_c is None:
        block_c, Cp = _pick_block_c(D, C, weight.dtype.itemsize,
                                    _vmem_budget_bytes())
    else:
        block_c = _round_up(block_c, _LANE)
        Cp = _round_up(_round_up(C, _LANE), block_c)
    if Cp != C:
        weight = jnp.pad(weight, ((0, 0), (0, Cp - C)))
        bias = jnp.pad(bias, (0, Cp - C))
    arrays = (gamma.reshape(1, D), beta.reshape(1, D), weight,
              bias.reshape(1, Cp))
    meta = dict(n_classes=C, block_c=block_c)
    return arrays, meta


# --------------------------------------------------------------------------- #
# Forward call
# --------------------------------------------------------------------------- #
@functools.partial(jax.jit, static_argnames=("n_classes", "block_c", "block_b"))
def mlp_head_apply(x, gamma2, beta2, weight, bias2, *, n_classes, block_c,
                   block_b=None):
    """x: (B, D); prepared params from prepare_mlp_head_params -> (B, n_classes)."""
    B, D = x.shape
    Cp = weight.shape[1]
    grid_c = Cp // block_c
    out_dtype = x.dtype

    x_it = x.dtype.itemsize
    w_it = weight.dtype.itemsize
    out_it = jnp.dtype(out_dtype).itemsize

    budget = _vmem_budget_bytes()
    if block_b is None:
        block_b = _pick_block_b(B, D, block_c, grid_c, x_it, w_it, out_it,
                                budget)
    # Rebalance so the last batch tile is not mostly padding.
    grid_b = pl.cdiv(max(B, 8), block_b)
    block_b = min(block_b, _round_up(pl.cdiv(_round_up(B, 8), grid_b), 8))
    Bp = block_b * grid_b
    if Bp != B:
        x = jnp.pad(x, ((0, Bp - B), (0, 0)))

    # Constant-index operands: one DMA, single VMEM buffer.
    resident = pl.Buffered(1)
    gamma_spec = pl.BlockSpec((1, D), lambda i, j: (0, 0),
                              pipeline_mode=resident)
    beta_spec = pl.BlockSpec((1, D), lambda i, j: (0, 0),
                             pipeline_mode=resident)
    if grid_c == 1:
        w_spec = pl.BlockSpec((D, block_c), lambda i, j: (0, j),
                              pipeline_mode=resident)
        b_spec = pl.BlockSpec((1, block_c), lambda i, j: (0, j),
                              pipeline_mode=resident)
    else:
        # Weight/bias tiles stream over the class axis -> default double buffer
        # so the DMA pipelines against MXU work.
        w_spec = pl.BlockSpec((D, block_c), lambda i, j: (0, j))
        b_spec = pl.BlockSpec((1, block_c), lambda i, j: (0, j))
    # Note: if profiling shows the x DMA exposed on v5e/v6e (small Cp, big D),
    # the x BlockSpec can take pipeline_mode=pl.Buffered(3); skipped on v7x
    # where VMEM is the scarce resource.

    usage = _vmem_usage(block_b, block_c, D, grid_c, x_it, w_it, out_it)
    vmem_limit = int(min(max(usage * 5 // 4, 16 << 20),
                         _vmem_capacity_bytes() * 9 // 10))

    cost = pl.CostEstimate(
        flops=2 * Bp * D * Cp,
        transcendentals=Bp,  # one rsqrt per row
        bytes_accessed=(Bp * D * x_it + D * Cp * w_it + Bp * Cp * out_it
                        + Cp * 4 + 2 * D * 4),
    )

    out = pl.pallas_call(
        mlp_head_kernel,
        out_shape=jax.ShapeDtypeStruct((Bp, Cp), out_dtype),
        grid_spec=pltpu.PrefetchScalarGridSpec(
            num_scalar_prefetch=0,
            grid=(grid_b, grid_c),
            in_specs=[
                pl.BlockSpec((block_b, D), lambda i, j: (i, 0)),  # x per batch tile
                gamma_spec,
                beta_spec,
                w_spec,
                b_spec,
            ],
            out_specs=pl.BlockSpec((block_b, block_c), lambda i, j: (i, j)),
            scratch_shapes=[pltpu.VMEM((block_b, D), weight.dtype)],
        ),
        compiler_params=pltpu.CompilerParams(
            # Batch tiles are independent (sharded over both TCs on v7x); the
            # class axis carries the x_norm scratch so it stays sequential.
            dimension_semantics=("parallel", "arbitrary"),
            vmem_limit_bytes=vmem_limit,
        ),
        cost_estimate=cost,
    )(x, gamma2, beta2, weight, bias2)

    # Strip batch / class padding.
    return out[:B, :n_classes]


def mlp_head(x, gamma, beta, weight, bias, *, block_b=None, block_c=None,
             weight_compute_dtype=None):
    """Convenience wrapper.  For repeated calls, run prepare_mlp_head_params
    once and call mlp_head_apply directly (avoids re-padding the weight)."""
    arrays, meta = prepare_mlp_head_params(
        gamma, beta, weight, bias, block_c=block_c,
        weight_compute_dtype=weight_compute_dtype)
    return mlp_head_apply(x, *arrays, n_classes=meta["n_classes"],
                          block_c=meta["block_c"], block_b=block_b)


# --------------------------------------------------------------------------- #
# Demo / correctness check
# --------------------------------------------------------------------------- #
if __name__ == "__main__":
    key = jax.random.PRNGKey(0)
    B, D, C = 8, 32, 16  # batch, embed_dim, n_classes (small demo shapes)

    k_x, k_w, k_b = jax.random.split(key, 3)
    x = jax.random.normal(k_x, (B, D), dtype=jnp.float32)

    gamma = jnp.ones((D,), dtype=jnp.float32)            # LayerNorm weight
    beta = jnp.zeros((D,), dtype=jnp.float32)            # LayerNorm bias
    bound = 1.0 / (D ** 0.5)
    weight = jax.random.uniform(k_w, (D, C), minval=-bound, maxval=bound,
                                dtype=jnp.float32)       # Linear weight (D, C)
    bias = jax.random.uniform(k_b, (C,), minval=-bound, maxval=bound,
                              dtype=jnp.float32)         # Linear bias

    # One-time param prep (padding / reshapes happen here, not per call).
    arrays, meta = prepare_mlp_head_params(gamma, beta, weight, bias)
    out = mlp_head_apply(x, *arrays, n_classes=meta["n_classes"],
                         block_c=meta["block_c"])
    jax.block_until_ready(out)

    # Reference in plain JAX.
    mean = jnp.mean(x, axis=-1, keepdims=True)
    var = jnp.mean((x - mean) ** 2, axis=-1, keepdims=True)
    x_norm = (x - mean) / jnp.sqrt(var + 1e-5) * gamma + beta
    ref = x_norm @ weight + bias
    assert out.shape == (B, C)
    assert jnp.allclose(out, ref, atol=1e-4, rtol=1e-4)

    print("KERNEL_OK")
</pallas_src>

<mosaic_0001>
module attributes {stable_mosaic.version = 11 : i64} {
  func.func @mlp_head_kernel(%arg0: i32, %arg1: i32, %arg2: memref<8x32xf32, #tpu.memory_space<vmem>>, %arg3: memref<1x32xf32, #tpu.memory_space<vmem>>, %arg4: memref<1x32xf32, #tpu.memory_space<vmem>>, %arg5: memref<32x128xf32, #tpu.memory_space<vmem>>, %arg6: memref<1x128xf32, #tpu.memory_space<vmem>>, %arg7: memref<8x128xf32, #tpu.memory_space<vmem>>, %arg8: memref<8x32xf32, #tpu.memory_space<vmem>>) attributes {dimension_semantics = [#tpu.dimension_semantics<parallel>, #tpu.dimension_semantics<arbitrary>], iteration_bounds = array<i64: 1, 1>, scalar_prefetch = 0 : i64, scratch_operands = 1 : i64, tpu.core_type = #tpu.core_type<tc>, window_params = [{transform_indices = @transform_0, window_bounds = array<i64: 8, 32>}, {pipeline_mode = #tpu.pipeline_mode<synchronous>, transform_indices = @transform_1, window_bounds = array<i64: 1, 32>}, {pipeline_mode = #tpu.pipeline_mode<synchronous>, transform_indices = @transform_2, window_bounds = array<i64: 1, 32>}, {pipeline_mode = #tpu.pipeline_mode<synchronous>, transform_indices = @transform_3, window_bounds = array<i64: 32, 128>}, {pipeline_mode = #tpu.pipeline_mode<synchronous>, transform_indices = @transform_4, window_bounds = array<i64: 1, 128>}, {transform_indices = @transform_5, window_bounds = array<i64: 8, 128>}]} {
    %c0_i32 = arith.constant 0 : i32
    %0 = arith.cmpi eq, %arg1, %c0_i32 : i32
    %1 = arith.extui %0 : i1 to i32
    %c0_i32_0 = arith.constant 0 : i32
    %2 = arith.cmpi ne, %1, %c0_i32_0 : i32
    scf.if %2 {
      %c0_8 = arith.constant 0 : index
      %c0_9 = arith.constant 0 : index
      %10 = vector.load %arg2[%c0_8, %c0_9] : memref<8x32xf32, #tpu.memory_space<vmem>>, vector<8x32xf32>
      %cst_10 = arith.constant dense<0.000000e+00> : vector<8xf32>
      %11 = vector.multi_reduction <add>, %10, %cst_10 [1] : vector<8x32xf32> to vector<8xf32>
      %12 = vector.shape_cast %11 : vector<8xf32> to vector<8x1xf32>
      %13 = arith.mulf %10, %10 : vector<8x32xf32>
      %cst_11 = arith.constant dense<0.000000e+00> : vector<8xf32>
      %14 = vector.multi_reduction <add>, %13, %cst_11 [1] : vector<8x32xf32> to vector<8xf32>
      %15 = vector.shape_cast %14 : vector<8xf32> to vector<8x1xf32>
      %cst_12 = arith.constant 3.125000e-02 : f32
      %16 = vector.broadcast %cst_12 : f32 to vector<8x1xf32>
      %17 = arith.mulf %12, %16 : vector<8x1xf32>
      %cst_13 = arith.constant 3.125000e-02 : f32
      %18 = vector.broadcast %cst_13 : f32 to vector<8x1xf32>
      %19 = arith.mulf %15, %18 : vector<8x1xf32>
      %20 = arith.mulf %17, %17 : vector<8x1xf32>
      %21 = arith.subf %19, %20 : vector<8x1xf32>
      %cst_14 = arith.constant 9.99999974E-6 : f32
      %22 = vector.broadcast %cst_14 : f32 to vector<8x1xf32>
      %23 = arith.addf %21, %22 : vector<8x1xf32>
      %24 = math.rsqrt %23 : vector<8x1xf32>
      %25 = vector.broadcast %17 : vector<8x1xf32> to vector<8x32xf32>
      %26 = arith.subf %10, %25 : vector<8x32xf32>
      %27 = vector.broadcast %24 : vector<8x1xf32> to vector<8x32xf32>
      %28 = arith.mulf %26, %27 : vector<8x32xf32>
      %c0_15 = arith.constant 0 : index
      %c0_16 = arith.constant 0 : index
      %29 = vector.load %arg3[%c0_15, %c0_16] : memref<1x32xf32, #tpu.memory_space<vmem>>, vector<1x32xf32>
      %30 = vector.broadcast %29 : vector<1x32xf32> to vector<8x32xf32>
      %31 = arith.mulf %28, %30 : vector<8x32xf32>
      %c0_17 = arith.constant 0 : index
      %c0_18 = arith.constant 0 : index
      %32 = vector.load %arg4[%c0_17, %c0_18] : memref<1x32xf32, #tpu.memory_space<vmem>>, vector<1x32xf32>
      %33 = vector.broadcast %32 : vector<1x32xf32> to vector<8x32xf32>
      %34 = arith.addf %31, %33 : vector<8x32xf32>
      %c0_19 = arith.constant 0 : index
      %c0_20 = arith.constant 0 : index
      %35 = vector.load %arg8[%c0_19, %c0_20] : memref<8x32xf32, #tpu.memory_space<vmem>>, vector<8x32xf32>
      tpu.vector_store %arg8[%c0_19, %c0_20], %34 {strides = array<i32>} : memref<8x32xf32, #tpu.memory_space<vmem>>, vector<8x32xf32>,
    } else {
    }
    %c0 = arith.constant 0 : index
    %c0_1 = arith.constant 0 : index
    %3 = vector.load %arg8[%c0, %c0_1] : memref<8x32xf32, #tpu.memory_space<vmem>>, vector<8x32xf32>
    %c0_2 = arith.constant 0 : index
    %c0_3 = arith.constant 0 : index
    %4 = vector.load %arg5[%c0_2, %c0_3] : memref<32x128xf32, #tpu.memory_space<vmem>>, vector<32x128xf32>
    %cst = arith.constant dense<0.000000e+00> : vector<8x128xf32>
    %5 = tpu.matmul %3, %4, %cst {dimension_numbers = #tpu.dot_dimension_numbers<[1], [0], [0], [1], [0, 0, 1, 1], [], []>} : vector<8x32xf32>, vector<32x128xf32>, vector<8x128xf32> -> vector<8x128xf32>
    %c0_4 = arith.constant 0 : index
    %c0_5 = arith.constant 0 : index
    %6 = vector.load %arg6[%c0_4, %c0_5] : memref<1x128xf32, #tpu.memory_space<vmem>>, vector<1x128xf32>
    %7 = vector.broadcast %6 : vector<1x128xf32> to vector<8x128xf32>
    %8 = arith.addf %5, %7 : vector<8x128xf32>
    %c0_6 = arith.constant 0 : index
    %c0_7 = arith.constant 0 : index
    %9 = vector.load %arg7[%c0_6, %c0_7] : memref<8x128xf32, #tpu.memory_space<vmem>>, vector<8x128xf32>
    tpu.vector_store %arg7[%c0_6, %c0_7], %8 {strides = array<i32>} : memref<8x128xf32, #tpu.memory_space<vmem>>, vector<8x128xf32>,
    return
  }
  func.func @transform_0(%arg0: i32, %arg1: i32) -> (i32, i32) {
    %c0_i32 = arith.constant 0 : i32
    %c0_i32_0 = arith.constant 0 : i32
    return %arg0, %c0_i32 : i32, i32
  }
  func.func @transform_1(%arg0: i32, %arg1: i32) -> (i32, i32) {
    %c0_i32 = arith.constant 0 : i32
    %c0_i32_0 = arith.constant 0 : i32
    %c0_i32_1 = arith.constant 0 : i32
    return %c0_i32, %c0_i32_0 : i32, i32
  }
  func.func @transform_2(%arg0: i32, %arg1: i32) -> (i32, i32) {
    %c0_i32 = arith.constant 0 : i32
    %c0_i32_0 = arith.constant 0 : i32
    %c0_i32_1 = arith.constant 0 : i32
    return %c0_i32, %c0_i32_0 : i32, i32
  }
  func.func @transform_3(%arg0: i32, %arg1: i32) -> (i32, i32) {
    %c0_i32 = arith.constant 0 : i32
    %c0_i32_0 = arith.constant 0 : i32
    return %c0_i32, %arg1 : i32, i32
  }
  func.func @transform_4(%arg0: i32, %arg1: i32) -> (i32, i32) {
    %c0_i32 = arith.constant 0 : i32
    %c0_i32_0 = arith.constant 0 : i32
    return %c0_i32, %arg1 : i32, i32
  }
  func.func @transform_5(%arg0: i32, %arg1: i32) -> (i32, i32) {
    %c0_i32 = arith.constant 0 : i32
    return %arg0, %arg1 : i32, i32
  }
}

</mosaic_0001>

<bundles_post_ra>
// kernel: mlp_head_apply.1
= control target key start
LH: loop header
LB: loop body
LE: loop exit
PB: predicated region body
PF: predicated region fallthrough
CT: control target
= control target key end

     0   :  { %10 = vsyncpa [#allocation4], 0  ;;  %s390_s0 = inlined_call_operand.hbm [shape: f32[8,32], index: 0, kind: input, shape index: {}]   ;;  %s391_s1 = inlined_call_operand.vmem [shape: f32[1,32], index: 1, kind: input, shape index: {}]   ;;  %s392_s2 = inlined_call_operand.vmem [shape: f32[1,32], index: 2, kind: input, shape index: {}]   ;;  %s393_s3 = inlined_call_operand.hbm [shape: f32[32,128], index: 3, kind: input, shape index: {}]   ;;  %s394_s4 = inlined_call_operand.vmem [shape: f32[1,128], index: 4, kind: input, shape index: {}]   ;;  %s395_s5 = inlined_call_operand.hbm [shape: f32[8,128], index: 5, kind: output, shape index: {}]  }
   0x1   :  { %11 = vsyncpa [#allocation7], 0 }
   0x2   :  { %12 = vsyncpa [#allocation5], 0  ;;  %s296_s18 = smov [#allocation3]   ;;  %s297_s20 = smov [#allocation6]  }
   0x3   :  { %s19_s19 = sshll.u32 %s296_s18, 4  ;;  %s32_s21 = sshll.u32 %s297_s20, 4  ;;  %s20_s19 = int_to_ptr.vmem [resolvable:$true] %s19_s19  ;;  %s334_s21 = int_to_ptr.vmem [resolvable:$true] %s32_s21 }
   0x4   :  { %s224_s24 = scalar_lea.hbm %s390_s0, 128 }
   0x5   :  { %p225_p0 = scmp.ne.s32.totalorder %s390_s0, %s224_s24  ;;  %p228_p1 = scmp.lt.u32.totalorder %s224_s24, %s390_s0 }
   0x7   :  { %p230_p2 = pnand %p228_p1, %p225_p0 }
   0x9   :  { %233 = shalt.err (!%p230_p2)
}
   0xa   :  { %s234_s29 = scalar_lea.vmem %s20_s19, 128  ;;  %p239_p4 = scmp.lt.s32.totalorder %s20_s19, %s20_s19 }
   0xb   :  { %p235_p3 = scmp.ne.s32.totalorder %s20_s19, %s234_s29  ;;  %p240_p5 = scmp.lt.s32.totalorder %s234_s29, %s234_s29 }
   0xd   :  { %p241_p6 = por %p240_p5, %p239_p4 }
   0xf   :  { %p242_p7 = pnand %p241_p6, %p235_p3 }
  0x11   :  { %245 = shalt.err (!%p242_p7)
}
  0x12   :  { %22 = dma.hbm_to_vmem [thread:$0]  %s390_s0, 128, %s20_s19, [#allocation4]  }
  0x13   :  { %s246_s9 = scalar_lea.hbm %s393_s3, 512 }
  0x14   :  { %p247_p8 = scmp.ne.s32.totalorder %s393_s3, %s246_s9  ;;  %p250_p9 = scmp.lt.u32.totalorder %s246_s9, %s393_s3 }
  0x16   :  { %p252_p10 = pnand %p250_p9, %p247_p8 }
  0x18   :  { %255 = shalt.err (!%p252_p10)
}
  0x19   :  { %s256_s14 = scalar_lea.vmem %s334_s21, 512  ;;  %p261_p12 = scmp.lt.s32.totalorder %s334_s21, %s334_s21 }
  0x1a   :  { %p257_p11 = scmp.ne.s32.totalorder %s334_s21, %s256_s14  ;;  %p262_p13 = scmp.lt.s32.totalorder %s256_s14, %s256_s14 }
  0x1c   :  { %p263_p0 = por %p262_p13, %p261_p12 }
  0x1e   :  { %p264_p1 = pnand %p263_p0, %p257_p11 }
  0x20   :  { %267 = shalt.err (!%p264_p1)
}
  0x21   :  { %s298_s0 = smov 128   ;;  %s299_s15 = smov 8  }
  0x22   :  { %38 = dma.hbm_to_vmem [thread:$0]  %s393_s3, 512, %s334_s21, [#allocation7], %s298_s0, %s298_s0, %s299_s15  }
  0x23   :  { %290 = dma.done.wait [#allocation4], 128  }
  0x24   :  { %291 = vsyncadd [#allocation4], 4294967168 }
  0x25   :  { %292 = dma.done.wait [#allocation7], 512  }
  0x26   :  { %293 = vsyncadd [#allocation7], 4294966784  ;;  %vm52_vm0 = vcmask 261120   ;;  %v51_v0 = vld [vmem:[#allocation3] sm:$0xff]  ;;  %v86_v4 = vld [vmem:[#allocation6] sm:$0xff]  ;;  %v300_v7 = vmov 0.0|0.0  }
  0x27   :  { %v53_v1 = vsel %vm52_vm0, %v51_v0, 0.0  ;;  %v56_v2 = vmul.f32 %v51_v0, %v51_v0  ;;  %v87_v5 = vld [vmem:[#allocation6 + $0x8] sm:$0xff]  ;;  %208 = vmatprep.subr.bf16.mxu0 %v300_v7  ;;  %v88_v8 = vld [vmem:[#allocation6 + $0x10] sm:$0xff]  ;;  %v89_v9 = vld [vmem:[#allocation6 + $0x18] sm:$0xff]  ;;  %vm301_vm1 = vmmov 0   ;;  %v302_v11 = vmov 0.0  }
  0x28   :  { %54 = vadd.xlane.f32.xlu0 %v53_v1  ;;  %v209_v6 = vpack.c.bf16 %v87_v5, %v86_v4  ;;  %v212_v10 = vpack.c.bf16 %v89_v9, %v88_v8  ;;  %205 = vmatprep.mubr.msk.f32.mxu0 %vm301_vm1, %v302_v11  ;;  %v188_v21 = vld [vmem:[%s391_s1] ss:$0 sm:$0xff]  ;;  %s303_s23 = smov [#allocation8]  }
  0x29   :  { %v57_v3 = vsel %vm52_vm0, %v56_v2, 0.0  ;;  %v189_v23 = vld [vmem:[%s392_s2] ss:$0 sm:$0xff]  ;;  %s178_s24 = sshll.u32 %s303_s23, 4  ;;  %s179_s24 = int_to_ptr.vmem [resolvable:$true] %s178_s24 }
  0x2a   :  { %210 = vmatpush3.bf16.msra.mxu0 %v209_v6  ;;  %v190_v27 = vld [vmem:[%s394_s4] ss:$0 sm:$0xff]  ;;  %s268_s1 = scalar_lea.vmem %s179_s24, 128  ;;  %p273_p3 = scmp.lt.s32.totalorder %s179_s24, %s179_s24 }
  0x2b   :  { %211 = vmatprep.subr.bf16.mxu0 %v300_v7  ;;  %p269_p2 = scmp.ne.s32.totalorder %s179_s24, %s268_s1  ;;  %p274_p4 = scmp.lt.s32.totalorder %s268_s1, %s268_s1 }
  0x2c   :  { %58 = vadd.xlane.f32.xlu0 %v57_v3 }
  0x2d   :  { %p275_p5 = por %p274_p4, %p273_p3 }
  0x2e   :  { %213 = vmatpush3.bf16.msra.mxu0 %v212_v10 }
  0x2f   :  { %p276_p6 = pnand %p275_p5, %p269_p2 }
  0xb5   :  { %v55_v12 = vpop.xlane.xlu0 %54 }
  0xb6   :  { %v60_v13 = vmul.f32 0.03125, %v55_v12 }
  0xb8   :  { %v62_v15 = vmul.f32 %v60_v13, %v60_v13  ;;  %v66_v19 = vsub.f32 %v51_v0, %v60_v13 }
  0xb9   :  { %v59_v14 = vpop.xlane.xlu0 %58 }
  0xba   :  { %v61_v16 = vmul.f32 0.03125, %v59_v14 }
  0xbc   :  { %v63_v17 = vsub.f32 %v61_v16, %v62_v15 }
  0xbe   :  { %v64_v18 = vadd.f32 1e-05, %v63_v17 }
  0xc0   :  { %222 = vrsqrt.f32 %v64_v18 }
  0xca   :  { %v223_v20 = vpop.eup %222 }
  0xcb   :  { %v67_v22 = vmul.f32 %v223_v20, %v66_v19 }
  0xcd   :  { %v75_v24 = vmul.f32 %v188_v21, %v67_v22 }
  0xcf   :  { %v83_v25 = vadd.f32 %v189_v23, %v75_v24 }
  0xd1   :  { %84 = vst.msk [vmem:[#allocation2] sm:$0xff] %vm52_vm0, %v83_v25 }
  0xd8   :  { %v85_v26 = vld [vmem:[#allocation2] sm:$0xff] }
  0xd9   :  { %206 = vmatmul.mubr.msk.f32.vlgmr.msra.gmra.mrb[0].mxu0 %vm52_vm0, %v85_v26 }
 0x1ac   :  { %v167_v28 = vpop.f32.mrb[0].mxu0 }
 0x1ad   :  { %v168_v29 = vadd.f32 %v190_v27, %v167_v28  ;;  %v207_v30 = vpop.f32.mrb[1].mxu0 }
 0x1af   :  { %171 = vst [vmem:[#allocation8] sm:$0xff] %v168_v29 }
 0x1b0   :  { %279 = shalt.err (!%p276_p6)
}
 0x1b1   :  { %s280_s26 = scalar_lea.hbm %s395_s5, 128 }
 0x1b2   :  { %p281_p7 = scmp.ne.s32.totalorder %s395_s5, %s280_s26  ;;  %p284_p8 = scmp.lt.u32.totalorder %s280_s26, %s395_s5 }
 0x1b4   :  { %p286_p9 = pnand %p284_p8, %p281_p7 }
 0x1b6   :  { %289 = shalt.err (!%p286_p9)
}
 0x1b7   :  { %181 = dma.vmem_to_hbm [thread:$0]  %s179_s24, 128, %s395_s5, [#allocation5]  }
 0x1b8   :  { %294 = dma.done.wait [#allocation5], 128  }
 0x1b9   :  { %295 = vsyncadd [#allocation5], 4294967168 }
 0x1ba   :  { %185 = vsyncpa [#allocation4], 1 }
 0x1bb   :  { %186 = vsyncpa [#allocation7], 1 }
 0x1bc   :  { %187 = vsyncpa [#allocation5], 1 }

</bundles_post_ra>
